<compile_context>
chip_gen: v7x
topology: tpu7x:2x2x1
jax: 0.10.0
libtpu: 0.0.40
codegen_flags: <defaults>
</compile_context>

<pallas_src>
import math
import functools

import jax
import jax.numpy as jnp
from jax.experimental import pallas as pl
from jax.experimental.pallas import tpu as pltpu

LOG_SQRT_2PI = 0.5 * math.log(2.0 * math.pi)


def _vmem_spec():
    return pl.BlockSpec(memory_space=pltpu.MemorySpace.VMEM)


# -------------------- fused kernel --------------------

def _fused_layer_kernel(x_ref, wmu_ref, wrho_ref, weps_ref,
                        bmu_ref, brho_ref, beps_ref,
                        out_ref, scal_ref,
                        *, out_features, pi, sigma1, sigma2):
    # ---- trace-time constants: no in-kernel logs/divides of constants ----
    log_pi = math.log(pi)
    log_1mpi = math.log1p(-pi)
    c1 = -math.log(sigma1) - LOG_SQRT_2PI      # N(0, sigma1) log-norm constant
    c2 = -math.log(sigma2) - LOG_SQRT_2PI
    k1 = 0.5 / (sigma1 * sigma1)
    k2 = 0.5 / (sigma2 * sigma2)

    def softplus(r):
        # numerically stable: max(r,0) + log1p(exp(-|r|))
        return jnp.maximum(r, 0.0) + jnp.log1p(jnp.exp(-jnp.abs(r)))

    def logaddexp(a, b):
        m = jnp.maximum(a, b)
        return m + jnp.log1p(jnp.exp(-jnp.abs(a - b)))

    def sample_and_logprobs(mu, rho, eps, mask):
        sigma = softplus(rho)
        w = mu + eps * sigma                    # reparameterised sample
        # Variational posterior N(w; mu, sigma): (w - mu) / sigma == eps, so the
        # quadratic term is just 0.5*eps^2 (no subtract, no divide).
        lq = (-LOG_SQRT_2PI - jnp.log(sigma)) - 0.5 * (eps * eps)
        # Scale-mixture prior in log-sum-exp form (no exp underflow); w*w shared.
        w2 = w * w
        a = (log_pi + c1) - w2 * k1
        b = (log_1mpi + c2) - w2 * k2
        lp = logaddexp(a, b)
        zero = jnp.zeros_like(lq)
        return (w,
                jnp.sum(jnp.where(mask, lq, zero)),
                jnp.sum(jnp.where(mask, lp, zero)))

    in_f, n_pad = wmu_ref.shape
    # Mask lane-padding columns (>= out_features) out of the reductions.
    wmask = jax.lax.broadcasted_iota(jnp.int32, (in_f, n_pad), 1) < out_features
    bmask = jax.lax.broadcasted_iota(jnp.int32, (1, n_pad), 1) < out_features

    w, lq_w, lp_w = sample_and_logprobs(wmu_ref[...], wrho_ref[...],
                                        weps_ref[...], wmask)
    b, lq_b, lp_b = sample_and_logprobs(bmu_ref[...], brho_ref[...],
                                        beps_ref[...], bmask)

    # relu(x @ w + b): bf16 MXU inputs, f32 accumulation; N is lane-dense.
    acc = jnp.dot(x_ref[...].astype(jnp.bfloat16), w.astype(jnp.bfloat16),
                  preferred_element_type=jnp.float32)
    out_ref[...] = jnp.maximum(acc + b, 0.0).astype(out_ref.dtype)

    # Pack the two reduced scalars into one lane-dense slab:
    #   [0, 0] = log_prior, [0, 1] = log_variational_posterior.
    lane = jax.lax.broadcasted_iota(jnp.int32, scal_ref.shape, 1)
    scal_ref[...] = (jnp.where(lane == 0, lp_w + lp_b, 0.0)
                     + jnp.where(lane == 1, lq_w + lq_b, 0.0)
                     ).astype(scal_ref.dtype)


# -------------------- wrappers --------------------

def init_layer_params(key, in_features, out_features):
    k1, k2, k3, k4 = jax.random.split(key, 4)
    return {
        "weight_mu": jax.random.uniform(k1, (in_features, out_features),
                                        jnp.float32, -0.2, 0.2),
        "weight_rho": jax.random.uniform(k2, (in_features, out_features),
                                         jnp.float32, -5.0, -4.0),
        "bias_mu": jax.random.uniform(k3, (out_features,),
                                      jnp.float32, -0.2, 0.2),
        "bias_rho": jax.random.uniform(k4, (out_features,),
                                       jnp.float32, -5.0, -4.0),
    }


def layer_forward(params, x, key, *, pi, sigma_1, sigma_2, training=True):
    """Mirrors Layer.forward with a single fused Pallas kernel:
    sample (w, b); out = relu(x @ w + b); in training mode also return
    log_prior and log_variational_posterior."""
    in_f, out_f = params["weight_mu"].shape
    batch = x.shape[0]
    n_pad = 128 * pl.cdiv(out_f, 128)           # lane-dense padded N

    # eps drawn outside the kernel (small, fused HBM read); padded with zeros.
    kw, kb = jax.random.split(key)
    eps_w = jax.random.normal(kw, (in_f, out_f), jnp.float32)
    eps_b = jax.random.normal(kb, (1, out_f), jnp.float32)

    def pad_n(a):
        return jnp.pad(a, ((0, 0), (0, n_pad - a.shape[-1])))

    inputs = (
        x,
        pad_n(params["weight_mu"]), pad_n(params["weight_rho"]), pad_n(eps_w),
        pad_n(params["bias_mu"].reshape(1, out_f)),
        pad_n(params["bias_rho"].reshape(1, out_f)),
        pad_n(eps_b),
    )

    kern = functools.partial(_fused_layer_kernel, out_features=out_f,
                             pi=pi, sigma1=sigma_1, sigma2=sigma_2)
    out_p, scal = pl.pallas_call(
        kern,
        out_shape=(jax.ShapeDtypeStruct((batch, n_pad), jnp.float32),
                   jax.ShapeDtypeStruct((1, 128), jnp.float32)),
        in_specs=[_vmem_spec()] * len(inputs),
        out_specs=(_vmem_spec(), _vmem_spec()),
    )(*inputs)

    out = out_p[:, :out_f]
    if training:
        return out, scal[0, 0], scal[0, 1]
    # Eval mode: the (negligible) log-prob work is computed but discarded.
    return out, None, None


if __name__ == "__main__":
    batch, in_features, out_features = 8, 32, 32
    pi, sigma_1, sigma_2 = 0.5, 1.0, math.exp(-6.0)

    root = jax.random.PRNGKey(0)
    k_param, k_x, k_noise = jax.random.split(root, 3)

    params = init_layer_params(k_param, in_features, out_features)
    x = jax.random.normal(k_x, (batch, in_features), jnp.float32)

    out, log_prior, log_var_post = layer_forward(
        params, x, k_noise, pi=pi, sigma_1=sigma_1, sigma_2=sigma_2,
        training=True)

    jax.block_until_ready((out, log_prior, log_var_post))
    assert out.shape == (batch, out_features)
    assert bool(jnp.all(out >= 0.0))          # relu output
    assert bool(jnp.isfinite(log_prior))
    assert bool(jnp.isfinite(log_var_post))
    print("KERNEL_OK")
</pallas_src>

<mosaic_0001>
module attributes {stable_mosaic.version = 11 : i64} {
  func.func @_fused_layer_kernel(%arg0: memref<8x32xf32, #tpu.memory_space<vmem>>, %arg1: memref<32x128xf32, #tpu.memory_space<vmem>>, %arg2: memref<32x128xf32, #tpu.memory_space<vmem>>, %arg3: memref<32x128xf32, #tpu.memory_space<vmem>>, %arg4: memref<1x128xf32, #tpu.memory_space<vmem>>, %arg5: memref<1x128xf32, #tpu.memory_space<vmem>>, %arg6: memref<1x128xf32, #tpu.memory_space<vmem>>, %arg7: memref<8x128xf32, #tpu.memory_space<vmem>>, %arg8: memref<1x128xf32, #tpu.memory_space<vmem>>) attributes {dimension_semantics = [], scalar_prefetch = 0 : i64, scratch_operands = 0 : i64, tpu.core_type = #tpu.core_type<tc>} {
    %0 = tpu.iota {dimensions = array<i32: 1>} : vector<32x128xi32>
    %c32_i32 = arith.constant 32 : i32
    %1 = vector.broadcast %c32_i32 : i32 to vector<32x128xi32>
    %2 = arith.cmpi slt, %0, %1 : vector<32x128xi32>
    %3 = tpu.iota {dimensions = array<i32: 1>} : vector<1x128xi32>
    %c32_i32_0 = arith.constant 32 : i32
    %4 = vector.broadcast %c32_i32_0 : i32 to vector<1x128xi32>
    %5 = arith.cmpi slt, %3, %4 : vector<1x128xi32>
    %c0 = arith.constant 0 : index
    %c0_1 = arith.constant 0 : index
    %6 = vector.load %arg1[%c0, %c0_1] : memref<32x128xf32, #tpu.memory_space<vmem>>, vector<32x128xf32>
    %c0_2 = arith.constant 0 : index
    %c0_3 = arith.constant 0 : index
    %7 = vector.load %arg2[%c0_2, %c0_3] : memref<32x128xf32, #tpu.memory_space<vmem>>, vector<32x128xf32>
    %c0_4 = arith.constant 0 : index
    %c0_5 = arith.constant 0 : index
    %8 = vector.load %arg3[%c0_4, %c0_5] : memref<32x128xf32, #tpu.memory_space<vmem>>, vector<32x128xf32>
    %cst = arith.constant 0.000000e+00 : f32
    %9 = vector.broadcast %cst : f32 to vector<32x128xf32>
    %10 = arith.maximumf %7, %9 : vector<32x128xf32>
    %11 = math.absf %7 : vector<32x128xf32>
    %cst_6 = arith.constant 0.000000e+00 : f32
    %12 = vector.broadcast %cst_6 : f32 to vector<32x128xf32>
    %13 = arith.subf %12, %11 : vector<32x128xf32>
    %14 = math.exp %13 : vector<32x128xf32>
    %15 = math.log1p %14 : vector<32x128xf32>
    %16 = arith.addf %10, %15 : vector<32x128xf32>
    %17 = arith.mulf %8, %16 : vector<32x128xf32>
    %18 = arith.addf %6, %17 : vector<32x128xf32>
    %19 = math.log %16 : vector<32x128xf32>
    %cst_7 = arith.constant -0.918938517 : f32
    %20 = vector.broadcast %cst_7 : f32 to vector<32x128xf32>
    %21 = arith.subf %20, %19 : vector<32x128xf32>
    %22 = arith.mulf %8, %8 : vector<32x128xf32>
    %cst_8 = arith.constant 5.000000e-01 : f32
    %23 = vector.broadcast %cst_8 : f32 to vector<32x128xf32>
    %24 = arith.mulf %23, %22 : vector<32x128xf32>
    %25 = arith.subf %21, %24 : vector<32x128xf32>
    %26 = arith.mulf %18, %18 : vector<32x128xf32>
    %cst_9 = arith.constant 5.000000e-01 : f32
    %27 = vector.broadcast %cst_9 : f32 to vector<32x128xf32>
    %28 = arith.mulf %26, %27 : vector<32x128xf32>
    %cst_10 = arith.constant -1.6120857 : f32
    %29 = vector.broadcast %cst_10 : f32 to vector<32x128xf32>
    %30 = arith.subf %29, %28 : vector<32x128xf32>
    %cst_11 = arith.constant 81377.3984 : f32
    %31 = vector.broadcast %cst_11 : f32 to vector<32x128xf32>
    %32 = arith.mulf %26, %31 : vector<32x128xf32>
    %cst_12 = arith.constant 4.38791418 : f32
    %33 = vector.broadcast %cst_12 : f32 to vector<32x128xf32>
    %34 = arith.subf %33, %32 : vector<32x128xf32>
    %35 = arith.maximumf %30, %34 : vector<32x128xf32>
    %36 = arith.subf %30, %34 : vector<32x128xf32>
    %37 = math.absf %36 : vector<32x128xf32>
    %cst_13 = arith.constant 0.000000e+00 : f32
    %38 = vector.broadcast %cst_13 : f32 to vector<32x128xf32>
    %39 = arith.subf %38, %37 : vector<32x128xf32>
    %40 = math.exp %39 : vector<32x128xf32>
    %41 = math.log1p %40 : vector<32x128xf32>
    %42 = arith.addf %35, %41 : vector<32x128xf32>
    %cst_14 = arith.constant 0.000000e+00 : f32
    %43 = vector.broadcast %cst_14 : f32 to vector<32x128xf32>
    %44 = arith.select %2, %25, %43 : vector<32x128xi1>, vector<32x128xf32>
    %45 = vector.shape_cast %44 : vector<32x128xf32> to vector<1x32x128xf32>
    %cst_15 = arith.constant dense<0.000000e+00> : vector<1xf32>
    %46 = vector.multi_reduction <add>, %45, %cst_15 [1, 2] : vector<1x32x128xf32> to vector<1xf32>
    %47 = vector.shape_cast %46 : vector<1xf32> to vector<1x1x1xf32>
    %48 = vector.extract %47[0, 0, 0] : f32 from vector<1x1x1xf32>
    %49 = arith.select %2, %42, %43 : vector<32x128xi1>, vector<32x128xf32>
    %50 = vector.shape_cast %49 : vector<32x128xf32> to vector<1x32x128xf32>
    %cst_16 = arith.constant dense<0.000000e+00> : vector<1xf32>
    %51 = vector.multi_reduction <add>, %50, %cst_16 [1, 2] : vector<1x32x128xf32> to vector<1xf32>
    %52 = vector.shape_cast %51 : vector<1xf32> to vector<1x1x1xf32>
    %53 = vector.extract %52[0, 0, 0] : f32 from vector<1x1x1xf32>
    %c0_17 = arith.constant 0 : index
    %c0_18 = arith.constant 0 : index
    %54 = vector.load %arg4[%c0_17, %c0_18] : memref<1x128xf32, #tpu.memory_space<vmem>>, vector<1x128xf32>
    %c0_19 = arith.constant 0 : index
    %c0_20 = arith.constant 0 : index
    %55 = vector.load %arg5[%c0_19, %c0_20] : memref<1x128xf32, #tpu.memory_space<vmem>>, vector<1x128xf32>
    %c0_21 = arith.constant 0 : index
    %c0_22 = arith.constant 0 : index
    %56 = vector.load %arg6[%c0_21, %c0_22] : memref<1x128xf32, #tpu.memory_space<vmem>>, vector<1x128xf32>
    %cst_23 = arith.constant 0.000000e+00 : f32
    %57 = vector.broadcast %cst_23 : f32 to vector<1x128xf32>
    %58 = arith.maximumf %55, %57 : vector<1x128xf32>
    %59 = math.absf %55 : vector<1x128xf32>
    %cst_24 = arith.constant 0.000000e+00 : f32
    %60 = vector.broadcast %cst_24 : f32 to vector<1x128xf32>
    %61 = arith.subf %60, %59 : vector<1x128xf32>
    %62 = math.exp %61 : vector<1x128xf32>
    %63 = math.log1p %62 : vector<1x128xf32>
    %64 = arith.addf %58, %63 : vector<1x128xf32>
    %65 = arith.mulf %56, %64 : vector<1x128xf32>
    %66 = arith.addf %54, %65 : vector<1x128xf32>
    %67 = math.log %64 : vector<1x128xf32>
    %cst_25 = arith.constant -0.918938517 : f32
    %68 = vector.broadcast %cst_25 : f32 to vector<1x128xf32>
    %69 = arith.subf %68, %67 : vector<1x128xf32>
    %70 = arith.mulf %56, %56 : vector<1x128xf32>
    %cst_26 = arith.constant 5.000000e-01 : f32
    %71 = vector.broadcast %cst_26 : f32 to vector<1x128xf32>
    %72 = arith.mulf %71, %70 : vector<1x128xf32>
    %73 = arith.subf %69, %72 : vector<1x128xf32>
    %74 = arith.mulf %66, %66 : vector<1x128xf32>
    %cst_27 = arith.constant 5.000000e-01 : f32
    %75 = vector.broadcast %cst_27 : f32 to vector<1x128xf32>
    %76 = arith.mulf %74, %75 : vector<1x128xf32>
    %cst_28 = arith.constant -1.6120857 : f32
    %77 = vector.broadcast %cst_28 : f32 to vector<1x128xf32>
    %78 = arith.subf %77, %76 : vector<1x128xf32>
    %cst_29 = arith.constant 81377.3984 : f32
    %79 = vector.broadcast %cst_29 : f32 to vector<1x128xf32>
    %80 = arith.mulf %74, %79 : vector<1x128xf32>
    %cst_30 = arith.constant 4.38791418 : f32
    %81 = vector.broadcast %cst_30 : f32 to vector<1x128xf32>
    %82 = arith.subf %81, %80 : vector<1x128xf32>
    %83 = arith.maximumf %78, %82 : vector<1x128xf32>
    %84 = arith.subf %78, %82 : vector<1x128xf32>
    %85 = math.absf %84 : vector<1x128xf32>
    %cst_31 = arith.constant 0.000000e+00 : f32
    %86 = vector.broadcast %cst_31 : f32 to vector<1x128xf32>
    %87 = arith.subf %86, %85 : vector<1x128xf32>
    %88 = math.exp %87 : vector<1x128xf32>
    %89 = math.log1p %88 : vector<1x128xf32>
    %90 = arith.addf %83, %89 : vector<1x128xf32>
    %cst_32 = arith.constant 0.000000e+00 : f32
    %91 = vector.broadcast %cst_32 : f32 to vector<1x128xf32>
    %92 = arith.select %5, %73, %91 : vector<1x128xi1>, vector<1x128xf32>
    %93 = vector.shape_cast %92 : vector<1x128xf32> to vector<1x1x128xf32>
    %cst_33 = arith.constant dense<0.000000e+00> : vector<1xf32>
    %94 = vector.multi_reduction <add>, %93, %cst_33 [1, 2] : vector<1x1x128xf32> to vector<1xf32>
    %95 = vector.shape_cast %94 : vector<1xf32> to vector<1x1x1xf32>
    %96 = vector.extract %95[0, 0, 0] : f32 from vector<1x1x1xf32>
    %97 = arith.select %5, %90, %91 : vector<1x128xi1>, vector<1x128xf32>
    %98 = vector.shape_cast %97 : vector<1x128xf32> to vector<1x1x128xf32>
    %cst_34 = arith.constant dense<0.000000e+00> : vector<1xf32>
    %99 = vector.multi_reduction <add>, %98, %cst_34 [1, 2] : vector<1x1x128xf32> to vector<1xf32>
    %100 = vector.shape_cast %99 : vector<1xf32> to vector<1x1x1xf32>
    %101 = vector.extract %100[0, 0, 0] : f32 from vector<1x1x1xf32>
    %c0_35 = arith.constant 0 : index
    %c0_36 = arith.constant 0 : index
    %102 = vector.load %arg0[%c0_35, %c0_36] : memref<8x32xf32, #tpu.memory_space<vmem>>, vector<8x32xf32>
    %103 = arith.truncf %102 : vector<8x32xf32> to vector<8x32xbf16>
    %104 = arith.truncf %18 : vector<32x128xf32> to vector<32x128xbf16>
    %cst_37 = arith.constant dense<0.000000e+00> : vector<8x128xf32>
    %105 = tpu.matmul %103, %104, %cst_37 {dimension_numbers = #tpu.dot_dimension_numbers<[1], [0], [0], [1], [0, 0, 1, 1], [], []>} : vector<8x32xbf16>, vector<32x128xbf16>, vector<8x128xf32> -> vector<8x128xf32>
    %106 = vector.broadcast %66 : vector<1x128xf32> to vector<8x128xf32>
    %107 = arith.addf %105, %106 : vector<8x128xf32>
    %cst_38 = arith.constant 0.000000e+00 : f32
    %108 = vector.broadcast %cst_38 : f32 to vector<8x128xf32>
    %109 = arith.maximumf %107, %108 : vector<8x128xf32>
    %c0_39 = arith.constant 0 : index
    %c0_40 = arith.constant 0 : index
    %110 = vector.load %arg7[%c0_39, %c0_40] : memref<8x128xf32, #tpu.memory_space<vmem>>, vector<8x128xf32>
    tpu.vector_store %arg7[%c0_39, %c0_40], %109 {strides = array<i32>} : memref<8x128xf32, #tpu.memory_space<vmem>>, vector<8x128xf32>,
    %111 = tpu.iota {dimensions = array<i32: 1>} : vector<1x128xi32>
    %c0_i32 = arith.constant 0 : i32
    %112 = vector.broadcast %c0_i32 : i32 to vector<1x128xi32>
    %113 = arith.cmpi eq, %111, %112 : vector<1x128xi32>
    %114 = arith.addf %53, %101 : f32
    %cst_41 = arith.constant 0.000000e+00 : f32
    %115 = vector.broadcast %114 : f32 to vector<1x128xf32>
    %116 = vector.broadcast %cst_41 : f32 to vector<1x128xf32>
    %117 = arith.select %113, %115, %116 : vector<1x128xi1>, vector<1x128xf32>
    %c1_i32 = arith.constant 1 : i32
    %118 = vector.broadcast %c1_i32 : i32 to vector<1x128xi32>
    %119 = arith.cmpi eq, %111, %118 : vector<1x128xi32>
    %120 = arith.addf %48, %96 : f32
    %cst_42 = arith.constant 0.000000e+00 : f32
    %121 = vector.broadcast %120 : f32 to vector<1x128xf32>
    %122 = vector.broadcast %cst_42 : f32 to vector<1x128xf32>
    %123 = arith.select %119, %121, %122 : vector<1x128xi1>, vector<1x128xf32>
    %124 = arith.addf %117, %123 : vector<1x128xf32>
    %c0_43 = arith.constant 0 : index
    %c0_44 = arith.constant 0 : index
    %125 = vector.load %arg8[%c0_43, %c0_44] : memref<1x128xf32, #tpu.memory_space<vmem>>, vector<1x128xf32>
    tpu.vector_store %arg8[%c0_43, %c0_44], %124 {strides = array<i32>} : memref<1x128xf32, #tpu.memory_space<vmem>>, vector<1x128xf32>,
    return
  }
}

</mosaic_0001>

<bundles_post_ra>
// kernel: tpu_custom_call.1
= control target key start
LH: loop header
LB: loop body
LE: loop exit
PB: predicated region body
PF: predicated region fallthrough
CT: control target
= control target key end

     0   :  { %14 = vsyncpa [#allocation3], 0  ;;  %s1017_s0 = inlined_call_operand.hbm [shape: f32[8,32], index: 0, kind: input, shape index: {}]   ;;  %s1018_s1 = inlined_call_operand.hbm [shape: f32[32,128], index: 1, kind: input, shape index: {}]   ;;  %s1019_s2 = inlined_call_operand.hbm [shape: f32[32,128], index: 2, kind: input, shape index: {}]   ;;  %s1020_s3 = inlined_call_operand.hbm [shape: f32[32,128], index: 3, kind: input, shape index: {}]   ;;  %s1021_s4 = inlined_call_operand.vmem [shape: f32[1,128], index: 4, kind: input, shape index: {}]   ;;  %s1022_s5 = inlined_call_operand.vmem [shape: f32[1,128], index: 5, kind: input, shape index: {}]   ;;  %s1023_s6 = inlined_call_operand.vmem [shape: f32[1,128], index: 6, kind: input, shape index: {}]   ;;  %s1024_s7 = inlined_call_operand.hbm [shape: f32[8,128], index: 7, kind: output, shape index: {0}]   ;;  %s1025_s8 = inlined_call_operand.hbm [shape: f32[1,128], index: 8, kind: output, shape index: {1}]  }
   0x1   :  { %15 = vsyncpa [#allocation6], 0 }
   0x2   :  { %16 = vsyncpa [#allocation9], 0 }
   0x3   :  { %17 = vsyncpa [#allocation4], 0 }
   0x4   :  { %18 = vsyncpa [#allocation12], 0  ;;  %s696_s27 = smov [#allocation5]   ;;  %s554_s9 = scalar_lea.hbm %s1018_s1, 512 }
   0x5   :  { %s34_s28 = sshll.u32 %s696_s27, 4  ;;  %p555_p0 = scmp.ne.s32.totalorder %s1018_s1, %s554_s9  ;;  %s35_s28 = int_to_ptr.vmem [resolvable:$true] %s34_s28 }
   0x6   :  { %p558_p1 = scmp.lt.u32.totalorder %s554_s9, %s1018_s1 }
   0x8   :  { %p560_p2 = pnand %p558_p1, %p555_p0 }
   0xa   :  { %563 = shalt.err (!%p560_p2)
}
   0xb   :  { %s564_s14 = scalar_lea.vmem %s35_s28, 512  ;;  %p569_p4 = scmp.lt.s32.totalorder %s35_s28, %s35_s28 }
   0xc   :  { %p565_p3 = scmp.ne.s32.totalorder %s35_s28, %s564_s14  ;;  %p570_p5 = scmp.lt.s32.totalorder %s564_s14, %s564_s14 }
   0xe   :  { %p571_p6 = por %p570_p5, %p569_p4 }
  0x10   :  { %p572_p7 = pnand %p571_p6, %p565_p3 }
  0x12   :  { %575 = shalt.err (!%p572_p7)
}
  0x13   :  { %s697_s15 = smov 128   ;;  %s698_s16 = smov 8  }
  0x14   :  { %40 = dma.hbm_to_vmem [thread:$0]  %s1018_s1, 512, %s35_s28, [#allocation6], %s697_s15, %s697_s15, %s698_s16  }
  0x15   :  { %s699_s19 = smov [#allocation2]   ;;  %s700_s21 = smov [#allocation7]  }
  0x16   :  { %s25_s20 = sshll.u32 %s699_s19, 4  ;;  %s46_s22 = sshll.u32 %s700_s21, 4  ;;  %s26_s20 = int_to_ptr.vmem [resolvable:$true] %s25_s20  ;;  %s47_s22 = int_to_ptr.vmem [resolvable:$true] %s46_s22 }
  0x17   :  { %s576_s25 = scalar_lea.hbm %s1017_s0, 128 }
  0x18   :  { %p577_p8 = scmp.ne.s32.totalorder %s1017_s0, %s576_s25  ;;  %p580_p9 = scmp.lt.u32.totalorder %s576_s25, %s1017_s0 }
  0x1a   :  { %p582_p10 = pnand %p580_p9, %p577_p8 }
  0x1c   :  { %585 = shalt.err (!%p582_p10)
}
  0x1d   :  { %s586_s1 = scalar_lea.vmem %s26_s20, 128  ;;  %p591_p12 = scmp.lt.s32.totalorder %s26_s20, %s26_s20 }
  0x1e   :  { %p587_p11 = scmp.ne.s32.totalorder %s26_s20, %s586_s1  ;;  %p592_p13 = scmp.lt.s32.totalorder %s586_s1, %s586_s1 }
  0x20   :  { %p593_p0 = por %p592_p13, %p591_p12 }
  0x22   :  { %p594_p1 = pnand %p593_p0, %p587_p11 }
  0x24   :  { %597 = shalt.err (!%p594_p1)
}
  0x25   :  { %28 = dma.hbm_to_vmem [thread:$0]  %s1017_s0, 128, %s26_s20, [#allocation3]  }
  0x26   :  { %s598_s12 = scalar_lea.hbm %s1019_s2, 512 }
  0x27   :  { %p599_p2 = scmp.ne.s32.totalorder %s1019_s2, %s598_s12  ;;  %p602_p3 = scmp.lt.u32.totalorder %s598_s12, %s1019_s2 }
  0x29   :  { %p604_p4 = pnand %p602_p3, %p599_p2 }
  0x2b   :  { %607 = shalt.err (!%p604_p4)
}
  0x2c   :  { %s608_s19 = scalar_lea.vmem %s47_s22, 512  ;;  %p613_p6 = scmp.lt.s32.totalorder %s47_s22, %s47_s22 }
  0x2d   :  { %p609_p5 = scmp.ne.s32.totalorder %s47_s22, %s608_s19  ;;  %p614_p7 = scmp.lt.s32.totalorder %s608_s19, %s608_s19 }
  0x2f   :  { %p615_p8 = por %p614_p7, %p613_p6 }
  0x31   :  { %p616_p9 = pnand %p615_p8, %p609_p5 }
  0x33   :  { %619 = shalt.err (!%p616_p9)
}
  0x34   :  { %52 = dma.hbm_to_vmem [thread:$0]  %s1019_s2, 512, %s47_s22, [#allocation6], %s697_s15, %s697_s15, %s698_s16  }
  0x35   :  { %s701_s21 = smov [#allocation8]   ;;  %s620_s26 = scalar_lea.hbm %s1020_s3, 512 }
  0x36   :  { %s58_s23 = sshll.u32 %s701_s21, 4  ;;  %p621_p10 = scmp.ne.s32.totalorder %s1020_s3, %s620_s26  ;;  %s59_s23 = int_to_ptr.vmem [resolvable:$true] %s58_s23 }
  0x37   :  { %p624_p11 = scmp.lt.u32.totalorder %s620_s26, %s1020_s3 }
  0x39   :  { %p626_p12 = pnand %p624_p11, %p621_p10 }
  0x3b   :  { %629 = shalt.err (!%p626_p12)
}
  0x3c   :  { %s630_s28 = scalar_lea.vmem %s59_s23, 512  ;;  %p635_p0 = scmp.lt.s32.totalorder %s59_s23, %s59_s23 }
  0x3d   :  { %p631_p13 = scmp.ne.s32.totalorder %s59_s23, %s630_s28  ;;  %p636_p1 = scmp.lt.s32.totalorder %s630_s28, %s630_s28 }
  0x3f   :  { %p637_p2 = por %p636_p1, %p635_p0 }
  0x41   :  { %p638_p3 = pnand %p637_p2, %p631_p13 }
  0x43   :  { %641 = shalt.err (!%p638_p3)
}
  0x44   :  { %64 = dma.hbm_to_vmem [thread:$0]  %s1020_s3, 512, %s59_s23, [#allocation9], %s697_s15, %s697_s15, %s698_s16  }
  0x45   :  { %686 = dma.done.wait [#allocation3], 128  }
  0x46   :  { %687 = vsyncadd [#allocation3], 4294967168 }
  0x47   :  { %688 = dma.done.wait [#allocation6], 1024  }
  0x48   :  { %689 = vsyncadd [#allocation6], 4294966272 }
  0x49   :  { %690 = dma.done.wait [#allocation9], 512  }
  0x4a   :  { %691 = vsyncadd [#allocation9], 4294966784  ;;  %v702_v0 = vmov 0.0   ;;  %vm703_vm0 = vmmov 0   ;;  %v810_v1 = vld [vmem:[#allocation7] sm:$0xff]  ;;  %v812_v2 = vld [vmem:[#allocation7 + $0x8] sm:$0xff]  ;;  %v84_v32 = vlaneseq }
  0x4b   :  { %478 = vmatprep.subr.bf16.mxu0 %v702_v0  ;;  %482 = vmatprep.mubr.msk.bf16.mxu0 %vm703_vm0, %v702_v0  ;;  %v103_v3 = vand.u32 2147483647, %v810_v1  ;;  %v104_v4 = vand.u32 2147483647, %v812_v2  ;;  %v816_v5 = vld [vmem:[#allocation7 + $0x10] sm:$0xff]  ;;  %v818_v7 = vld [vmem:[#allocation7 + $0x18] sm:$0xff] }
  0x4c   :  { %v823_v9 = vld [vmem:[%s1022_s5] sm:$0x1]  ;;  %v105_v11 = vand.u32 2147483647, %v816_v5  ;;  %v106_v12 = vand.u32 2147483647, %v818_v7 }
  0x4d   :  { %v107_v6 = vsub.f32 0.0, %v103_v3  ;;  %v108_v8 = vsub.f32 0.0, %v104_v4  ;;  %v311_v16 = vand.u32 2147483647, %v823_v9  ;;  %v95_v40 = vld [vmem:[#allocation8] sm:$0xff]  ;;  %v99_v42 = vmax.f32 %v810_v1, 0.0 }
  0x4e   :  { %v109_v14 = vsub.f32 0.0, %v105_v11  ;;  %v110_v15 = vsub.f32 0.0, %v106_v12  ;;  %v179_v43 = vmul.f32 %v95_v40, %v95_v40  ;;  %v830_v44 = vand.u32 127, %v84_v32  ;;  %v96_v50 = vld [vmem:[#allocation8 + $0x8] sm:$0xff]  ;;  %v377_v52 = vld [vmem:[#allocation2] sm:$0xff] }
  0x4f   :  { %v111_v10 = vmul.f32 1.442695, %v107_v6  ;;  %v113_v13 = vmul.f32 1.442695, %v108_v8  ;;  %v312_v19 = vsub.f32 0.0, %v311_v16  ;;  %v100_v45 = vmax.f32 %v812_v2, 0.0 }
  0x50   :  { %v115_v17 = vmul.f32 1.442695, %v109_v14  ;;  %v117_v18 = vmul.f32 1.442695, %v110_v15  ;;  %v841_v57 = vmul.f32 %v96_v50, %v96_v50  ;;  %v843_v61 = vmul.f32 0.5, %v179_v43 }
  0x51   :  { %504 = vpow2.f32 %v111_v10  ;;  %v313_v20 = vmul.f32 1.442695, %v312_v19  ;;  %v101_v62 = vmax.f32 %v816_v5, 0.0  ;;  %v102_v2 = vmax.f32 %v818_v7, 0.0 }
  0x52   :  { %506 = vpow2.f32 %v113_v13  ;;  %v310_v4 = vmax.f32 %v823_v9, 0.0  ;;  %v87_v13 = vld [vmem:[#allocation5] sm:$0xff]  ;;  %vm387_vm6 = vcmask 261120   ;;  %vm86_vm7 = vcmp.lt.s32.totalorder %v830_v44, 32 }
  0x53   :  { %508 = vpow2.f32 %v115_v17  ;;  %v88_v17 = vld [vmem:[#allocation5 + $0x8] sm:$0xff]  ;;  %vm355_vm8 = vcmask 1040384  }
  0x54   :  { %510 = vpow2.f32 %v117_v18 }
  0x55   :  { %512 = vpow2.f32 %v313_v20 }
  0x5b   :  { %v505_v21 = vpop.eup %504 }
  0x5c   :  { %v507_v22 = vpop.eup %506  ;;  %v119_v23 = vadd.f32 1.0, %v505_v21  ;;  %v122_v26 = vmul.f32 -0.5, %v505_v21  ;;  %v125_v35 = vand.u32 2147483647, %v505_v21 }
  0x5d   :  { %v128_v24 = vadd.f32 1.0, %v507_v22  ;;  %v509_v25 = vpop.eup %508  ;;  %v131_v28 = vmul.f32 -0.5, %v507_v22  ;;  %v134_v38 = vand.u32 2147483647, %v507_v22 }
  0x5e   :  { %514 = vlog2.f32 %v119_v23  ;;  %v511_v27 = vpop.eup %510  ;;  %v137_v29 = vadd.f32 1.0, %v509_v25  ;;  %v123_v34 = vadd.f32 1.0, %v122_v26  ;;  %v140_v36 = vmul.f32 -0.5, %v509_v25  ;;  %v98_v26 = vld [vmem:[#allocation8 + $0x18] sm:$0xff] }
  0x5f   :  { %516 = vlog2.f32 %v128_v24  ;;  %v513_v30 = vpop.eup %512  ;;  %v146_v31 = vadd.f32 1.0, %v511_v27  ;;  %v132_v37 = vadd.f32 1.0, %v131_v28  ;;  %v149_v39 = vmul.f32 -0.5, %v511_v27 }
  0x60   :  { %518 = vlog2.f32 %v137_v29  ;;  %v315_v33 = vadd.f32 1.0, %v513_v30  ;;  %v318_v41 = vmul.f32 -0.5, %v513_v30  ;;  %v124_v46 = vmul.f32 %v505_v21, %v123_v34 }
  0x61   :  { %520 = vlog2.f32 %v146_v31  ;;  %vm833_vm1 = vcmp.lt.f32.partialorder %v125_v35, 0.0004427343  ;;  %v141_v48 = vadd.f32 1.0, %v140_v36  ;;  %v133_v51 = vmul.f32 %v507_v22, %v132_v37  ;;  %v97_v22 = vld [vmem:[#allocation8 + $0x10] sm:$0xff]  ;;  %v90_v37 = vld [vmem:[#allocation5 + $0x18] sm:$0xff] }
  0x62   :  { %522 = vlog2.f32 %v315_v33  ;;  %vm837_vm2 = vcmp.lt.f32.partialorder %v134_v38, 0.0004427343  ;;  %v143_v53 = vand.u32 2147483647, %v509_v25  ;;  %v150_v54 = vadd.f32 1.0, %v149_v39  ;;  %v89_v31 = vld [vmem:[#allocation5 + $0x10] sm:$0xff] }
  0x63   :  { %v152_v58 = vand.u32 2147483647, %v511_v27  ;;  %v319_v59 = vadd.f32 1.0, %v318_v41  ;;  %v321_v63 = vand.u32 2147483647, %v513_v30  ;;  %v142_v3 = vmul.f32 %v509_v25, %v141_v48 }
  0x64   :  { %vm852_vm3 = vcmp.lt.f32.partialorder %v143_v53, 0.0004427343  ;;  %v151_v12 = vmul.f32 %v511_v27, %v150_v54  ;;  %v181_v29 = vmul.f32 %v97_v22, %v97_v22  ;;  %v182_v35 = vmul.f32 %v98_v26, %v98_v26  ;;  %v309_v39 = vld [vmem:[%s1023_s6] sm:$0x1] }
  0x65   :  { %vm856_vm4 = vcmp.lt.f32.partialorder %v152_v58, 0.0004427343  ;;  %v320_v7 = vmul.f32 %v513_v30, %v319_v59  ;;  %vm860_vm5 = vcmp.lt.f32.partialorder %v321_v63, 0.0004427343  ;;  %v307_v58 = vld [vmem:[%s1021_s4] sm:$0x1] }
  0x66   :  { %v184_v59 = vmul.f32 0.5, %v841_v57  ;;  %v185_v11 = vmul.f32 0.5, %v181_v29  ;;  %s704_s4 = smov [#allocation10]  }
  0x67   :  { %s449_s10 = sshll.u32 %s704_s4, 4  ;;  %s450_s10 = int_to_ptr.vmem [resolvable:$true] %s449_s10 }
  0x68   :  { %v515_v49 = vpop.eup %514  ;;  %s642_s11 = scalar_lea.vmem %s450_s10, 128  ;;  %p647_p5 = scmp.lt.s32.totalorder %s450_s10, %s450_s10 }
  0x69   :  { %v517_v55 = vpop.eup %516  ;;  %v121_v56 = vmul.f32 0.6931472, %v515_v49  ;;  %p643_p4 = scmp.ne.s32.totalorder %s450_s10, %s642_s11  ;;  %p648_p6 = scmp.lt.s32.totalorder %s642_s11, %s642_s11 }
  0x6a   :  { %v130_v60 = vmul.f32 0.6931472, %v517_v55  ;;  %v519_v6 = vpop.eup %518 }
  0x6b   :  { %v127_v1 = vsel %vm833_vm1, %v124_v46, %v121_v56  ;;  %v521_v5 = vpop.eup %520  ;;  %v139_v15 = vmul.f32 0.6931472, %v519_v6  ;;  %v330_v56 = vmul.f32 %v309_v39, %v309_v39  ;;  %p649_p7 = por %p648_p6, %p647_p5 }
  0x6c   :  { %v136_v8 = vsel %vm837_vm2, %v133_v51, %v130_v60  ;;  %v155_v10 = vadd.f32 %v127_v1, %v99_v42  ;;  %v523_v9 = vpop.eup %522  ;;  %v148_v19 = vmul.f32 0.6931472, %v521_v5 }
  0x6d   :  { %v156_v14 = vadd.f32 %v136_v8, %v100_v45  ;;  %v145_v23 = vsel %vm852_vm3, %v142_v3, %v139_v15  ;;  %v317_v24 = vmul.f32 0.6931472, %v523_v9  ;;  %v331_v5 = vmul.f32 0.5, %v330_v56  ;;  %p650_p8 = pnand %p649_p7, %p643_p4 }
  0x6e   :  { %v159_v18 = vmul.f32 %v155_v10, %v95_v40  ;;  %524 = vlog2.f32 %v155_v10  ;;  %v154_v27 = vsel %vm856_vm4, %v151_v12, %v148_v19  ;;  %v157_v28 = vadd.f32 %v145_v23, %v101_v62 }
  0x6f   :  { %v160_v21 = vmul.f32 %v156_v14, %v96_v50  ;;  %526 = vlog2.f32 %v156_v14  ;;  %v158_v33 = vadd.f32 %v154_v27, %v102_v2  ;;  %v323_v34 = vsel %vm860_vm5, %v320_v7, %v317_v24 }
  0x70   :  { %v163_v25 = vadd.f32 %v159_v18, %v87_v13  ;;  %v161_v38 = vmul.f32 %v157_v28, %v97_v22  ;;  %v324_v40 = vadd.f32 %v323_v34, %v310_v4  ;;  %528 = vlog2.f32 %v157_v28 }
  0x71   :  { %v164_v30 = vadd.f32 %v160_v21, %v88_v17  ;;  %v162_v43 = vmul.f32 %v158_v33, %v98_v26  ;;  %530 = vlog2.f32 %v158_v33  ;;  %v378_v4 = vpack.c.bf16 %v377_v52, %v377_v52 }
  0x72   :  { %v191_v36 = vmul.f32 %v163_v25, %v163_v25  ;;  %v165_v47 = vadd.f32 %v161_v38, %v89_v31  ;;  %532 = vlog2.f32 %v324_v40  ;;  %v325_v51 = vmul.f32 %v324_v40, %v309_v39 }
  0x73   :  { %v192_v41 = vmul.f32 %v164_v30, %v164_v30  ;;  %v379_v42 = vpack.c.bf16 %v164_v30, %v163_v25  ;;  %v166_v50 = vadd.f32 %v162_v43, %v90_v37  ;;  %v186_v14 = vmul.f32 0.5, %v182_v35 }
  0x74   :  { %v873_v45 = vmul.f32 0.5, %v191_v36  ;;  %v875_v46 = vmul.f32 81377.4, %v191_v36  ;;  %v193_v55 = vmul.f32 %v165_v47, %v165_v47  ;;  %v901_v8 = vadd.f32 %v325_v51, %v307_v58 }
  0x75   :  { %v877_v48 = vmul.f32 0.5, %v192_v41  ;;  %v879_v49 = vmul.f32 81377.4, %v192_v41  ;;  %479 = vmatpush3.bf16.msra.mxu0 %v379_v42  ;;  %v380_v63 = vpack.c.bf16 %v166_v50, %v165_v47 }
  0x76   :  { %v199_v53 = vsub.f32 -1.6120857, %v873_v45  ;;  %v207_v54 = vsub.f32 4.387914, %v875_v46  ;;  %480 = vmatprep.subr.bf16.mxu0 %v702_v0  ;;  %v194_v0 = vmul.f32 %v166_v50, %v166_v50  ;;  %v895_v3 = vmul.f32 0.5, %v193_v55 }
  0x77   :  { %v200_v60 = vsub.f32 -1.6120857, %v877_v48  ;;  %v208_v62 = vsub.f32 4.387914, %v879_v49  ;;  %v903_v16 = vmul.f32 81377.4, %v193_v55  ;;  %v333_v9 = vmul.f32 %v901_v8, %v901_v8 }
  0x78   :  { %v525_v1 = vpop.eup %524  ;;  %v215_v2 = vsub.f32 %v199_v53, %v207_v54  ;;  %v908_v20 = vmul.f32 0.5, %v194_v0  ;;  %v201_v21 = vsub.f32 -1.6120857, %v895_v3  ;;  %v922_v47 = vmul.f32 81377.4, %v194_v0 }
  0x79   :  { %v527_v6 = vpop.eup %526  ;;  %v216_v57 = vsub.f32 %v200_v60, %v208_v62  ;;  %481 = vmatpush3.bf16.msra.mxu0 %v380_v63  ;;  %v168_v10 = vmul.f32 0.6931472, %v525_v1  ;;  %v912_v26 = vmul.f32 0.5, %v333_v9  ;;  %v914_v31 = vmul.f32 81377.4, %v333_v9 }
  0x7a   :  { %v219_v12 = vand.u32 2147483647, %v215_v2  ;;  %v170_v13 = vmul.f32 0.6931472, %v527_v6  ;;  %v529_v17 = vpop.eup %528  ;;  %v202_v52 = vsub.f32 -1.6120857, %v908_v20 }
  0x7b   :  { %v220_v15 = vand.u32 2147483647, %v216_v57  ;;  %v175_v7 = vsub.f32 -0.9189385, %v168_v10  ;;  %v531_v22 = vpop.eup %530  ;;  %v172_v24 = vmul.f32 0.6931472, %v529_v17 }
  0x7c   :  { %v223_v18 = vsub.f32 0.0, %v219_v12  ;;  %v176_v19 = vsub.f32 -0.9189385, %v170_v13  ;;  %483 = vmatmul.mubr.msk.bf16.vlgmr.msra.gmra.mrb[0].mxu0 %vm387_vm6, %v378_v4  ;;  %v533_v27 = vpop.eup %532  ;;  %v174_v29 = vmul.f32 0.6931472, %v531_v22 }
  0x7d   :  { %v224_v23 = vsub.f32 0.0, %v220_v15  ;;  %v187_v25 = vsub.f32 %v175_v7, %v843_v61  ;;  %v328_v34 = vmul.f32 0.6931472, %v533_v27  ;;  %v177_v35 = vsub.f32 -0.9189385, %v172_v24 }
  0x7e   :  { %v227_v28 = vmul.f32 1.442695, %v223_v18  ;;  %v188_v30 = vsub.f32 %v176_v19, %v184_v59  ;;  %v178_v36 = vsub.f32 -0.9189385, %v174_v29  ;;  %v335_v42 = vsub.f32 -1.6120857, %v912_v26 }
  0x7f   :  { %v229_v33 = vmul.f32 1.442695, %v224_v23  ;;  %v275_v37 = vsel %vm86_vm7, %v187_v25, 0.0  ;;  %v329_v61 = vsub.f32 -0.9189385, %v328_v34  ;;  %v189_v39 = vsub.f32 %v177_v35, %v185_v11 }
  0x80   :  { %534 = vpow2.f32 %v227_v28  ;;  %v276_v38 = vsel %vm86_vm7, %v188_v30, 0.0  ;;  %v190_v41 = vsub.f32 %v178_v36, %v186_v14  ;;  %v337_v43 = vsub.f32 4.387914, %v914_v31 }
  0x81   :  { %536 = vpow2.f32 %v229_v33  ;;  %v279_v40 = vadd.f32 %v276_v38, %v275_v37  ;;  %v332_v50 = vsub.f32 %v329_v61, %v331_v5  ;;  %v277_v51 = vsel %vm86_vm7, %v189_v39, 0.0 }
  0x82   :  { %v209_v55 = vsub.f32 4.387914, %v903_v16  ;;  %v278_v56 = vsel %vm86_vm7, %v190_v41, 0.0  ;;  %v339_v59 = vsub.f32 %v335_v42, %v337_v43  ;;  %v210_v1 = vsub.f32 4.387914, %v922_v47 }
  0x83   :  { %v280_v58 = vadd.f32 %v279_v40, %v277_v51  ;;  %v354_v63 = vsel %vm86_vm7, %v332_v50, 0.0  ;;  %v338_v48 = vmax.f32 %v335_v42, %v337_v43 }
  0x84   :  { %v217_v2 = vsub.f32 %v201_v21, %v209_v55  ;;  %v356_v0 = vsel %vm355_vm8, %v354_v63, 0.0  ;;  %v340_v6 = vand.u32 2147483647, %v339_v59  ;;  %v218_v57 = vsub.f32 %v202_v52, %v210_v1 }
  0x85   :  { %v281_v4 = vadd.f32 %v280_v58, %v278_v56  ;;  %357 = vadd.xlane.f32.xlu1 %v356_v0  ;;  %v211_v59 = vmax.f32 %v199_v53, %v207_v54  ;;  %v212_v63 = vmax.f32 %v200_v60, %v208_v62  ;;  %v213_v60 = vmax.f32 %v201_v21, %v209_v55 }
  0x86   :  { %v221_v10 = vand.u32 2147483647, %v217_v2  ;;  %v341_v11 = vsub.f32 0.0, %v340_v6  ;;  %v222_v12 = vand.u32 2147483647, %v218_v57  ;;  %v214_v3 = vmax.f32 %v202_v52, %v210_v1 }
  0x87   :  { %282 = vadd.xlane.f32.xlu0 %v281_v4 }
  0x88   :  { %v225_v5 = vsub.f32 0.0, %v221_v10  ;;  %v342_v14 = vmul.f32 1.442695, %v341_v11  ;;  %v226_v7 = vsub.f32 0.0, %v222_v12 }
  0x8a   :  { %v535_v13 = vpop.eup %534  ;;  %v231_v9 = vmul.f32 1.442695, %v225_v5  ;;  %538 = vpow2.f32 %v342_v14  ;;  %v233_v19 = vmul.f32 1.442695, %v226_v7 }
  0x8b   :  { %v537_v15 = vpop.eup %536  ;;  %v235_v17 = vadd.f32 1.0, %v535_v13  ;;  %v238_v22 = vmul.f32 -0.5, %v535_v13  ;;  %v241_v24 = vand.u32 2147483647, %v535_v13 }
  0x8c   :  { %v244_v18 = vadd.f32 1.0, %v537_v15  ;;  %540 = vpow2.f32 %v231_v9  ;;  %v247_v23 = vmul.f32 -0.5, %v537_v15  ;;  %v250_v29 = vand.u32 2147483647, %v537_v15 }
  0x8d   :  { %542 = vlog2.f32 %v235_v17  ;;  %v239_v25 = vadd.f32 1.0, %v238_v22  ;;  %vm946_vm9 = vcmp.lt.f32.partialorder %v241_v24, 0.0004427343 }
  0x8e   :  { %544 = vpow2.f32 %v233_v19  ;;  %v248_v27 = vadd.f32 1.0, %v247_v23  ;;  %vm950_vm10 = vcmp.lt.f32.partialorder %v250_v29, 0.0004427343 }
  0x8f   :  { %546 = vlog2.f32 %v244_v18  ;;  %v240_v61 = vmul.f32 %v535_v13, %v239_v25 }
  0x90   :  { %v249_v39 = vmul.f32 %v537_v15, %v248_v27 }
  0x94   :  { %v539_v28 = vpop.eup %538 }
  0x95   :  { %v344_v33 = vadd.f32 1.0, %v539_v28  ;;  %v347_v41 = vmul.f32 -0.5, %v539_v28  ;;  %v350_v57 = vand.u32 2147483647, %v539_v28 }
  0x96   :  { %v541_v30 = vpop.eup %540 }
  0x97   :  { %v543_v34 = vpop.eup %542  ;;  %v253_v36 = vadd.f32 1.0, %v541_v30  ;;  %548 = vlog2.f32 %v344_v33  ;;  %v256_v58 = vmul.f32 -0.5, %v541_v30  ;;  %v348_v6 = vadd.f32 1.0, %v347_v41 }
  0x98   :  { %v545_v37 = vpop.eup %544  ;;  %v237_v38 = vmul.f32 0.6931472, %v543_v34  ;;  %v259_v46 = vand.u32 2147483647, %v541_v30  ;;  %vm351_vm11 = vcmp.lt.f32.partialorder %v350_v57, 0.0004427343 }
  0x99   :  { %v547_v40 = vpop.eup %546  ;;  %550 = vlog2.f32 %v253_v36  ;;  %v262_v51 = vadd.f32 1.0, %v545_v37  ;;  %v265_v4 = vmul.f32 -0.5, %v545_v37  ;;  %v257_v10 = vadd.f32 1.0, %v256_v58 }
  0x9a   :  { %v246_v56 = vmul.f32 0.6931472, %v547_v40  ;;  %v243_v2 = vsel %vm946_vm9, %v240_v61, %v237_v38  ;;  %v349_v54 = vmul.f32 %v539_v28, %v348_v6  ;;  %v268_v49 = vand.u32 2147483647, %v545_v37 }
  0x9b   :  { %552 = vlog2.f32 %v262_v51  ;;  %v271_v11 = vadd.f32 %v243_v2, %v211_v59  ;;  %v266_v53 = vadd.f32 1.0, %v265_v4  ;;  %v258_v62 = vmul.f32 %v541_v30, %v257_v10 }
  0x9c   :  { %v252_v0 = vsel %vm950_vm10, %v249_v39, %v246_v56  ;;  %vm260_vm12 = vcmp.lt.f32.partialorder %v259_v46, 0.0004427343  ;;  %vm269_vm13 = vcmp.lt.f32.partialorder %v268_v49, 0.0004427343  ;;  %v383_v2 = vshrl.u32 %v84_v32, 7 }
  0x9d   :  { %v272_v45 = vadd.f32 %v252_v0, %v212_v63  ;;  %v291_v14 = vsel %vm86_vm7, %v271_v11, 0.0  ;;  %v267_v7 = vmul.f32 %v545_v37, %v266_v53 }
  0x9e   :  { %v384_v10 = vsub.s32 0, %v383_v2 }
  0x9f   :  { %v292_v15 = vsel %vm86_vm7, %v272_v45, 0.0 }
  0xa0   :  { %v295_v55 = vadd.f32 %v292_v15, %v291_v14  ;;  %v385_v11 = vrot.slane %v901_v8, %v384_v10 }
  0xa1   :  { %v549_v12 = vpop.eup %548 }
  0xa2   :  { %v346_v13 = vmul.f32 0.6931472, %v549_v12 }
  0xa3   :  { %v551_v5 = vpop.eup %550 }
  0xa4   :  { %v255_v31 = vmul.f32 0.6931472, %v551_v5  ;;  %v352_v42 = vsel %vm351_vm11, %v349_v54, %v346_v13 }
  0xa5   :  { %v553_v26 = vpop.eup %552  ;;  %v353_v16 = vadd.f32 %v352_v42, %v338_v48 }
  0xa6   :  { %v261_v21 = vsel %vm260_vm12, %v258_v62, %v255_v31  ;;  %v264_v43 = vmul.f32 0.6931472, %v553_v26 }
  0xa7   :  { %v273_v9 = vadd.f32 %v261_v21, %v213_v60  ;;  %v366_v17 = vsel %vm86_vm7, %v353_v16, 0.0 }
  0xa8   :  { %v270_v18 = vsel %vm269_vm13, %v267_v7, %v264_v43  ;;  %v367_v19 = vsel %vm355_vm8, %v366_v17, 0.0 }
  0xa9   :  { %v274_v22 = vadd.f32 %v270_v18, %v214_v3  ;;  %v293_v23 = vsel %vm86_vm7, %v273_v9, 0.0  ;;  %368 = vadd.xlane.f32.xlu1 %v367_v19 }
  0xaa   :  { %v296_v47 = vadd.f32 %v295_v55, %v293_v23 }
  0xab   :  { %v294_v20 = vsel %vm86_vm7, %v274_v22, 0.0 }
  0xac   :  { %v297_v52 = vadd.f32 %v296_v47, %v294_v20 }
  0xae   :  { %298 = vadd.xlane.f32.xlu0 %v297_v52 }
 0x112   :  { %v358_v33 = vpop.xlane.xlu1 %357 }
 0x113   :  { %v359_v34 = vrot.slane %v358_v33, 4 }
 0x114   :  { %v283_v1 = vpop.xlane.xlu0 %282 }
 0x115   :  { %v284_v24 = vrot.slane %v283_v1, 4  ;;  %v360_v35 = vadd.f32 %v359_v34, %v358_v33 }
 0x117   :  { %v285_v25 = vadd.f32 %v284_v24, %v283_v1  ;;  %v361_v61 = vrot.slane %v360_v35, 2 }
 0x119   :  { %v286_v27 = vrot.slane %v285_v25, 2  ;;  %v362_v51 = vadd.f32 %v361_v61, %v360_v35 }
 0x11b   :  { %v287_v28 = vadd.f32 %v286_v27, %v285_v25  ;;  %v363_v63 = vrot.slane %v362_v51, 1 }
 0x11d   :  { %v288_v29 = vrot.slane %v287_v28, 1  ;;  %v364_v57 = vadd.f32 %v363_v63, %v362_v51 }
 0x11f   :  { %v289_v30 = vadd.f32 %v288_v29, %v287_v28 }
 0x121   :  { %486 = vpush %v289_v30 }
 0x136   :  { %v369_v36 = vpop.xlane.xlu1 %368 }
 0x137   :  { %v370_v37 = vrot.slane %v369_v36, 4 }
 0x139   :  { %v371_v38 = vadd.f32 %v370_v37, %v369_v36 }
 0x13b   :  { %v299_v39 = vpop.xlane.xlu0 %298  ;;  %v372_v40 = vrot.slane %v371_v38, 2 }
 0x13c   :  { %v300_v41 = vrot.slane %v299_v39, 4 }
 0x13d   :  { %v373_v56 = vadd.f32 %v372_v40, %v371_v38 }
 0x13e   :  { %v301_v50 = vadd.f32 %v300_v41, %v299_v39 }
 0x13f   :  { %v374_v4 = vrot.slane %v373_v56, 1 }
 0x140   :  { %v302_v58 = vrot.slane %v301_v50, 2 }
 0x141   :  { %v375_v46 = vadd.f32 %v374_v4, %v373_v56 }
 0x142   :  { %v303_v59 = vadd.f32 %v302_v58, %v301_v50 }
 0x144   :  { %v304_v0 = vrot.slane %v303_v59, 1 }
 0x146   :  { %v305_v6 = vadd.f32 %v304_v0, %v303_v59 }
 0x148   :  { %488 = vpush %v305_v6 }
 0x149   :  { %490 = vpush %v364_v57 }
 0x14a   :  { %492 = vpush %v375_v46 }
 0x14f   :  { %v425_v45 = vpop.f32.mrb[0].mxu0 }
 0x150   :  { %v426_v53 = vadd.f32 %v425_v45, %v385_v11  ;;  %v484_v54 = vpop.f32.mrb[1].mxu0 }
 0x151   :  { %v428_v49 = vpop.f32.mrb[2].mxu0 }
 0x152   :  { %v431_v12 = vmax.f32 %v426_v53, 0.0  ;;  %v485_v48 = vpop.f32.mrb[3].mxu0 }
 0x154   :  { %432 = vst [vmem:[#allocation10] sm:$0xff] %v431_v12 }
 0x155   :  { %653 = shalt.err (!%p650_p8)
}
 0x156   :  { %s654_s14 = scalar_lea.hbm %s1024_s7, 128 }
 0x157   :  { %p655_p9 = scmp.ne.s32.totalorder %s1024_s7, %s654_s14  ;;  %p658_p10 = scmp.lt.u32.totalorder %s654_s14, %s1024_s7 }
 0x159   :  { %p660_p11 = pnand %p658_p10, %p655_p9 }
 0x15b   :  { %663 = shalt.err (!%p660_p11)
}
 0x15c   :  { %452 = dma.vmem_to_hbm [thread:$0]  %s450_s10, 128, %s1024_s7, [#allocation4]   ;;  %vm437_vm14 = vcmp.eq.s32.totalorder %v830_v44, 1  ;;  %vm433_vm15 = vcmp.eq.s32.totalorder %v830_v44, 0 }
 0x15d   :  { %s487_s23 = spop %486  ;;  %s705_s30 = smov [#allocation11]  }
 0x15e   :  { %s459_s1 = sshll.u32 %s705_s30, 4  ;;  %s460_s1 = int_to_ptr.vmem [resolvable:$true] %s459_s1 }
 0x15f   :  { %s664_s7 = scalar_lea.vmem %s460_s1, 16  ;;  %s668_s28 = scalar_lea.vmem %s460_s1, 32 }
 0x160   :  { %p665_p12 = scmp.ne.s32.totalorder %s460_s1, %s664_s7  ;;  %p669_p13 = scmp.lt.s32.totalorder %s460_s1, %s460_s1 }
 0x161   :  { %p670_p0 = scmp.lt.s32.totalorder %s668_s28, %s664_s7 }
 0x163   :  { %p671_p1 = por %p670_p0, %p669_p13 }
 0x165   :  { %p672_p2 = pnand %p671_p1, %p665_p12 }
 0x179   :  { %s489_s24 = spop %488 }
 0x17a   :  { %s491_s25 = spop %490 }
 0x17b   :  { %s438_s26 = sadd.f32 %s491_s25, %s487_s23  ;;  %s493_s27 = spop %492 }
 0x17c   :  { %s434_s29 = sadd.f32 %s493_s27, %s489_s24 }
 0x17d   :  { %v439_v32 = vstv %s438_s26 }
 0x17e   :  { %v440_v8 = vsel %vm437_vm14, %v439_v32, 0.0  ;;  %v435_v60 = vstv %s434_s29 }
 0x17f   :  { %v436_v62 = vsel %vm433_vm15, %v435_v60, 0.0 }
 0x180   :  { %v441_v5 = vadd.f32 %v440_v8, %v436_v62 }
 0x182   :  { %442 = vst [vmem:[#allocation11] sm:$0x1] %v441_v5 }
 0x183   :  { %675 = shalt.err (!%p672_p2)
}
 0x184   :  { %s676_s3 = scalar_lea.hbm %s1025_s8, 16 }
 0x185   :  { %p677_p3 = scmp.ne.s32.totalorder %s1025_s8, %s676_s3  ;;  %p680_p4 = scmp.lt.u32.totalorder %s676_s3, %s1025_s8 }
 0x187   :  { %p682_p5 = pnand %p680_p4, %p677_p3 }
 0x189   :  { %685 = shalt.err (!%p682_p5)
}
 0x18a   :  { %462 = dma.vmem_to_hbm [thread:$0]  %s460_s1, 16, %s1025_s8, [#allocation12]  }
 0x18b   :  { %692 = dma.done.wait [#allocation4], 128  }
 0x18c   :  { %693 = vsyncadd [#allocation4], 4294967168 }
 0x18d   :  { %694 = dma.done.wait [#allocation12], 16  }
 0x18e   :  { %695 = vsyncadd [#allocation12], 4294967280 }
 0x18f   :  { %469 = vsyncpa [#allocation3], 1 }
 0x190   :  { %470 = vsyncpa [#allocation6], 1 }
 0x191   :  { %471 = vsyncpa [#allocation9], 1 }
 0x192   :  { %472 = vsyncpa [#allocation4], 1 }
 0x193   :  { %473 = vsyncpa [#allocation12], 1 }

</bundles_post_ra>
